<compile_context>
chip_gen: v6e
topology: v6e:2x2x1
jax: 0.10.0
libtpu: 0.0.40
codegen_flags: <defaults>
</compile_context>

<pallas_src>
import jax
import jax.numpy as jnp
from jax import lax
from jax.experimental import pallas as pl
from jax.experimental.pallas import tpu as pltpu

# ---- problem sizes (small, consistent with the module; COUT divisible by 8 groups) ----
N, H, W = 2, 16, 16
CIN, COUT = 8, 16
GROUPS = 8
EPS = 1e-5
HW = H * W
# tap t = ky*3 + kx  ->  spatial offset (dy, dx) = (ky-1, kx-1)
TAPS = tuple((ky - 1, kx - 1) for ky in range(3) for kx in range(3))


def residual_block_kernel(x_ref, masks_ref, mnorm_ref,
                          w1_ref, b1_ref, g1_ref, be1_ref,
                          w2_ref, b2_ref, g2_ref, be2_ref,
                          ws_ref, bs_ref, o_ref):
    x = x_ref[0]                                   # (CIN, HW) f32, channel-major
    mnorm = mnorm_ref[...]                         # (COUT, COUT): group membership / (Cg*HW)

    def conv3x3(h_cm, w_ref_, b_ref_):
        """Same-padded 3x3 conv as a single im2col matmul:
           (Cout, 9*Cin) x (9*Cin, HW) -> (Cout, HW)."""
        pieces = []
        for t, (dy, dx) in enumerate(TAPS):
            if dy == 0 and dx == 0:
                pieces.append(h_cm)                # centre tap: no shift, mask all-ones
            else:
                shift = (-(dy * W + dx)) % HW      # static lane roll: picks x[hw + dy*W + dx]
                m = masks_ref[pl.ds(t, 1), :]      # (1, HW) zero-padding border mask
                pieces.append(pltpu.roll(h_cm, shift=shift, axis=1) * m)
        pmat = jnp.concatenate(pieces, axis=0).astype(jnp.bfloat16)   # (9*Cin, HW)
        y = jnp.dot(w_ref_[...], pmat, preferred_element_type=jnp.float32)
        return y + b_ref_[...]                     # (COUT, HW) f32

    def group_norm(h, gamma, beta):
        # per-channel lane reductions, then fold channels of the same group via tiny matmul
        row_sum = jnp.sum(h, axis=1, keepdims=True)        # (C, 1)
        row_sq = jnp.sum(h * h, axis=1, keepdims=True)     # (C, 1)
        mean = jnp.dot(mnorm, row_sum, preferred_element_type=jnp.float32)  # per-channel group mean
        ex2 = jnp.dot(mnorm, row_sq, preferred_element_type=jnp.float32)
        var = ex2 - mean * mean                            # biased, as in nn.GroupNorm
        inv = lax.rsqrt(var + EPS)
        return (h - mean) * (inv * gamma) + beta

    # conv1 -> GN -> ReLU
    h = conv3x3(x, w1_ref, b1_ref)
    h = jnp.maximum(group_norm(h, g1_ref[...], be1_ref[...]), 0.0)
    # conv2 -> GN
    h2 = conv3x3(h, w2_ref, b2_ref)
    h2 = group_norm(h2, g2_ref[...], be2_ref[...])
    # 1x1 shortcut (in_channels != out_channels branch)
    sc = jnp.dot(ws_ref[...], x.astype(jnp.bfloat16),
                 preferred_element_type=jnp.float32) + bs_ref[...]
    o_ref[0] = jnp.maximum(h2 + sc, 0.0)


def _tap_masks():
    """(9, HW) f32: mask of valid (non-zero-padded) positions for each 3x3 tap."""
    hh = jnp.arange(HW, dtype=jnp.int32) // W
    ww = jnp.arange(HW, dtype=jnp.int32) % W
    rows = []
    for dy, dx in TAPS:
        valid = (hh + dy >= 0) & (hh + dy < H) & (ww + dx >= 0) & (ww + dx < W)
        rows.append(valid.astype(jnp.float32))
    return jnp.stack(rows, axis=0)


def _group_matrix():
    """(COUT, COUT) f32: row c averages over all channels in c's group and all HW."""
    g = jnp.arange(COUT) // (COUT // GROUPS)
    same = (g[:, None] == g[None, :]).astype(jnp.float32)
    return same / float((COUT // GROUPS) * HW)


def residual_block(x, params):
    """x: (N, CIN, H, W) f32 (NCHW, like the PyTorch module). Params in PyTorch layouts."""
    w1, b1, g1, be1, w2, b2, g2, be2, ws, bs = params

    x_cm = x.reshape(N, CIN, HW)                                   # pure reshape (NCHW)
    masks = _tap_masks()
    mnorm = _group_matrix()
    col = lambda v: v.reshape(COUT, 1).astype(jnp.float32)
    # (O, I, 3, 3) -> (O, ky, kx, I) -> (O, 9*I): rows match patch-matrix tap ordering
    w1_cm = w1.transpose(0, 2, 3, 1).reshape(COUT, 9 * CIN).astype(jnp.bfloat16)
    w2_cm = w2.transpose(0, 2, 3, 1).reshape(COUT, 9 * COUT).astype(jnp.bfloat16)
    ws_cm = ws.reshape(COUT, CIN).astype(jnp.bfloat16)

    operands = (masks, mnorm,
                w1_cm, col(b1), col(g1), col(be1),
                w2_cm, col(b2), col(g2), col(be2),
                ws_cm, col(bs))
    full = lambda a: pl.BlockSpec(a.shape, lambda n: (0,) * a.ndim)

    out = pl.pallas_call(
        residual_block_kernel,
        out_shape=jax.ShapeDtypeStruct((N, COUT, HW), jnp.float32),
        grid=(N,),
        in_specs=[pl.BlockSpec((1, CIN, HW), lambda n: (n, 0, 0))]
                 + [full(a) for a in operands],
        out_specs=pl.BlockSpec((1, COUT, HW), lambda n: (n, 0, 0)),
        compiler_params=pltpu.CompilerParams(dimension_semantics=("parallel",)),
    )(x_cm, *operands)
    return out.reshape(N, COUT, H, W)


# ---- pure-JAX NCHW reference (exact fp32) for verification ---------------------------
def reference(x, params):
    w1, b1, g1, be1, w2, b2, g2, be2, ws, bs = params

    def conv(h, w, b):
        y = lax.conv_general_dilated(h, w, (1, 1), "SAME",
                                     dimension_numbers=("NCHW", "OIHW", "NCHW"))
        return y + b.reshape(1, -1, 1, 1)

    def gn(h, gamma, beta):
        n, c, hh, ww = h.shape
        hr = h.reshape(n, GROUPS, c // GROUPS, hh, ww)
        mean = hr.mean(axis=(2, 3, 4), keepdims=True)
        var = ((hr - mean) ** 2).mean(axis=(2, 3, 4), keepdims=True)
        hn = ((hr - mean) / jnp.sqrt(var + EPS)).reshape(n, c, hh, ww)
        return hn * gamma.reshape(1, -1, 1, 1) + beta.reshape(1, -1, 1, 1)

    h = jax.nn.relu(gn(conv(x, w1, b1), g1, be1))
    h = gn(conv(h, w2, b2), g2, be2)
    sc = conv(x, ws, bs)                           # 1x1 shortcut conv
    return jax.nn.relu(h + sc)


if __name__ == "__main__":
    key = jax.random.PRNGKey(0)
    ks = jax.random.split(key, 12)

    x = jax.random.normal(ks[0], (N, CIN, H, W), jnp.float32)      # NCHW like the module

    # synthetic parameters in nn.Conv2d / nn.GroupNorm layouts
    w1 = 0.1 * jax.random.normal(ks[1], (COUT, CIN, 3, 3), jnp.float32)
    b1 = 0.1 * jax.random.normal(ks[2], (COUT,), jnp.float32)
    g1 = 1.0 + 0.1 * jax.random.normal(ks[3], (COUT,), jnp.float32)
    be1 = 0.1 * jax.random.normal(ks[4], (COUT,), jnp.float32)
    w2 = 0.1 * jax.random.normal(ks[5], (COUT, COUT, 3, 3), jnp.float32)
    b2 = 0.1 * jax.random.normal(ks[6], (COUT,), jnp.float32)
    g2 = 1.0 + 0.1 * jax.random.normal(ks[7], (COUT,), jnp.float32)
    be2 = 0.1 * jax.random.normal(ks[8], (COUT,), jnp.float32)
    ws = 0.1 * jax.random.normal(ks[9], (COUT, CIN, 1, 1), jnp.float32)
    bs = 0.1 * jax.random.normal(ks[10], (COUT,), jnp.float32)

    params = (w1, b1, g1, be1, w2, b2, g2, be2, ws, bs)

    out = jax.block_until_ready(residual_block(x, params))
    ref = reference(x, params)

    assert out.shape == (N, COUT, H, W)
    # tolerance covers bf16 MXU inputs (f32 accumulation); reference is exact fp32
    err = float(jnp.max(jnp.abs(out - ref)))
    assert jnp.allclose(out, ref, atol=3e-2, rtol=2e-2), err

    print("KERNEL_OK")
</pallas_src>

<mosaic_0001>
module attributes {stable_mosaic.version = 11 : i64} {
  func.func @residual_block_kernel(%arg0: i32, %arg1: memref<1x8x256xf32, #tpu.memory_space<vmem>>, %arg2: memref<9x256xf32, #tpu.memory_space<vmem>>, %arg3: memref<16x16xf32, #tpu.memory_space<vmem>>, %arg4: memref<16x72xbf16, #tpu.memory_space<vmem>>, %arg5: memref<16x1xf32, #tpu.memory_space<vmem>>, %arg6: memref<16x1xf32, #tpu.memory_space<vmem>>, %arg7: memref<16x1xf32, #tpu.memory_space<vmem>>, %arg8: memref<16x144xbf16, #tpu.memory_space<vmem>>, %arg9: memref<16x1xf32, #tpu.memory_space<vmem>>, %arg10: memref<16x1xf32, #tpu.memory_space<vmem>>, %arg11: memref<16x1xf32, #tpu.memory_space<vmem>>, %arg12: memref<16x8xbf16, #tpu.memory_space<vmem>>, %arg13: memref<16x1xf32, #tpu.memory_space<vmem>>, %arg14: memref<1x16x256xf32, #tpu.memory_space<vmem>>) attributes {dimension_semantics = [#tpu.dimension_semantics<parallel>], iteration_bounds = array<i64: 2>, scalar_prefetch = 0 : i64, scratch_operands = 0 : i64, tpu.core_type = #tpu.core_type<tc>, window_params = [{transform_indices = @transform_0, window_bounds = array<i64: 1, 8, 256>}, {pipeline_mode = #tpu.pipeline_mode<synchronous>, transform_indices = @transform_1, window_bounds = array<i64: 9, 256>}, {pipeline_mode = #tpu.pipeline_mode<synchronous>, transform_indices = @transform_2, window_bounds = array<i64: 16, 16>}, {pipeline_mode = #tpu.pipeline_mode<synchronous>, transform_indices = @transform_3, window_bounds = array<i64: 16, 72>}, {pipeline_mode = #tpu.pipeline_mode<synchronous>, transform_indices = @transform_4, window_bounds = array<i64: 16, 1>}, {pipeline_mode = #tpu.pipeline_mode<synchronous>, transform_indices = @transform_5, window_bounds = array<i64: 16, 1>}, {pipeline_mode = #tpu.pipeline_mode<synchronous>, transform_indices = @transform_6, window_bounds = array<i64: 16, 1>}, {pipeline_mode = #tpu.pipeline_mode<synchronous>, transform_indices = @transform_7, window_bounds = array<i64: 16, 144>}, {pipeline_mode = #tpu.pipeline_mode<synchronous>, transform_indices = @transform_8, window_bounds = array<i64: 16, 1>}, {pipeline_mode = #tpu.pipeline_mode<synchronous>, transform_indices = @transform_9, window_bounds = array<i64: 16, 1>}, {pipeline_mode = #tpu.pipeline_mode<synchronous>, transform_indices = @transform_10, window_bounds = array<i64: 16, 1>}, {pipeline_mode = #tpu.pipeline_mode<synchronous>, transform_indices = @transform_11, window_bounds = array<i64: 16, 8>}, {pipeline_mode = #tpu.pipeline_mode<synchronous>, transform_indices = @transform_12, window_bounds = array<i64: 16, 1>}, {transform_indices = @transform_13, window_bounds = array<i64: 1, 16, 256>}]} {
    %c0 = arith.constant 0 : index
    %c0_0 = arith.constant 0 : index
    %c0_1 = arith.constant 0 : index
    %0 = vector.load %arg1[%c0, %c0_0, %c0_1] : memref<1x8x256xf32, #tpu.memory_space<vmem>>, vector<1x8x256xf32>
    %1 = vector.shape_cast %0 : vector<1x8x256xf32> to vector<8x256xf32>
    %c0_2 = arith.constant 0 : index
    %c0_3 = arith.constant 0 : index
    %2 = vector.load %arg3[%c0_2, %c0_3] : memref<16x16xf32, #tpu.memory_space<vmem>>, vector<16x16xf32>
    %c0_4 = arith.constant 0 : index
    %c0_5 = arith.constant 0 : index
    %3 = vector.load %arg2[%c0_4, %c0_5] : memref<9x256xf32, #tpu.memory_space<vmem>>, vector<1x256xf32>
    %c17_i32 = arith.constant 17 : i32
    %4 = tpu.dynamic_rotate %1 by %c17_i32 dim 1 : vector<8x256xf32>, i32 -> vector<8x256xf32>
    %5 = vector.broadcast %3 : vector<1x256xf32> to vector<8x256xf32>
    %6 = arith.mulf %4, %5 : vector<8x256xf32>
    %c1 = arith.constant 1 : index
    %c0_6 = arith.constant 0 : index
    %7 = vector.load %arg2[%c1, %c0_6] : memref<9x256xf32, #tpu.memory_space<vmem>>, vector<1x256xf32>
    %c16_i32 = arith.constant 16 : i32
    %8 = tpu.dynamic_rotate %1 by %c16_i32 dim 1 : vector<8x256xf32>, i32 -> vector<8x256xf32>
    %9 = vector.broadcast %7 : vector<1x256xf32> to vector<8x256xf32>
    %10 = arith.mulf %8, %9 : vector<8x256xf32>
    %c2 = arith.constant 2 : index
    %c0_7 = arith.constant 0 : index
    %11 = vector.load %arg2[%c2, %c0_7] : memref<9x256xf32, #tpu.memory_space<vmem>>, vector<1x256xf32>
    %c15_i32 = arith.constant 15 : i32
    %12 = tpu.dynamic_rotate %1 by %c15_i32 dim 1 : vector<8x256xf32>, i32 -> vector<8x256xf32>
    %13 = vector.broadcast %11 : vector<1x256xf32> to vector<8x256xf32>
    %14 = arith.mulf %12, %13 : vector<8x256xf32>
    %c3 = arith.constant 3 : index
    %c0_8 = arith.constant 0 : index
    %15 = vector.load %arg2[%c3, %c0_8] : memref<9x256xf32, #tpu.memory_space<vmem>>, vector<1x256xf32>
    %c1_i32 = arith.constant 1 : i32
    %16 = tpu.dynamic_rotate %1 by %c1_i32 dim 1 : vector<8x256xf32>, i32 -> vector<8x256xf32>
    %17 = vector.broadcast %15 : vector<1x256xf32> to vector<8x256xf32>
    %18 = arith.mulf %16, %17 : vector<8x256xf32>
    %c5 = arith.constant 5 : index
    %c0_9 = arith.constant 0 : index
    %19 = vector.load %arg2[%c5, %c0_9] : memref<9x256xf32, #tpu.memory_space<vmem>>, vector<1x256xf32>
    %c255_i32 = arith.constant 255 : i32
    %20 = tpu.dynamic_rotate %1 by %c255_i32 dim 1 : vector<8x256xf32>, i32 -> vector<8x256xf32>
    %21 = vector.broadcast %19 : vector<1x256xf32> to vector<8x256xf32>
    %22 = arith.mulf %20, %21 : vector<8x256xf32>
    %c6 = arith.constant 6 : index
    %c0_10 = arith.constant 0 : index
    %23 = vector.load %arg2[%c6, %c0_10] : memref<9x256xf32, #tpu.memory_space<vmem>>, vector<1x256xf32>
    %c241_i32 = arith.constant 241 : i32
    %24 = tpu.dynamic_rotate %1 by %c241_i32 dim 1 : vector<8x256xf32>, i32 -> vector<8x256xf32>
    %25 = vector.broadcast %23 : vector<1x256xf32> to vector<8x256xf32>
    %26 = arith.mulf %24, %25 : vector<8x256xf32>
    %c7 = arith.constant 7 : index
    %c0_11 = arith.constant 0 : index
    %27 = vector.load %arg2[%c7, %c0_11] : memref<9x256xf32, #tpu.memory_space<vmem>>, vector<1x256xf32>
    %c240_i32 = arith.constant 240 : i32
    %28 = tpu.dynamic_rotate %1 by %c240_i32 dim 1 : vector<8x256xf32>, i32 -> vector<8x256xf32>
    %29 = vector.broadcast %27 : vector<1x256xf32> to vector<8x256xf32>
    %30 = arith.mulf %28, %29 : vector<8x256xf32>
    %c8 = arith.constant 8 : index
    %c0_12 = arith.constant 0 : index
    %31 = vector.load %arg2[%c8, %c0_12] : memref<9x256xf32, #tpu.memory_space<vmem>>, vector<1x256xf32>
    %c239_i32 = arith.constant 239 : i32
    %32 = tpu.dynamic_rotate %1 by %c239_i32 dim 1 : vector<8x256xf32>, i32 -> vector<8x256xf32>
    %33 = vector.broadcast %31 : vector<1x256xf32> to vector<8x256xf32>
    %34 = arith.mulf %32, %33 : vector<8x256xf32>
    %35 = tpu.concatenate %6, %10, %14, %18, %1, %22, %26, %30, %34 in 0 : vector<8x256xf32>, vector<8x256xf32>, vector<8x256xf32>, vector<8x256xf32>, vector<8x256xf32>, vector<8x256xf32>, vector<8x256xf32>, vector<8x256xf32>, vector<8x256xf32> -> vector<72x256xf32>
    %36 = arith.truncf %35 : vector<72x256xf32> to vector<72x256xbf16>
    %c0_13 = arith.constant 0 : index
    %c0_14 = arith.constant 0 : index
    %37 = vector.load %arg4[%c0_13, %c0_14] : memref<16x72xbf16, #tpu.memory_space<vmem>>, vector<16x72xbf16>
    %cst = arith.constant dense<0.000000e+00> : vector<16x256xf32>
    %38 = tpu.matmul %37, %36, %cst {dimension_numbers = #tpu.dot_dimension_numbers<[1], [0], [0], [1], [0, 0, 1, 1], [], []>} : vector<16x72xbf16>, vector<72x256xbf16>, vector<16x256xf32> -> vector<16x256xf32>
    %c0_15 = arith.constant 0 : index
    %c0_16 = arith.constant 0 : index
    %39 = vector.load %arg5[%c0_15, %c0_16] : memref<16x1xf32, #tpu.memory_space<vmem>>, vector<16x1xf32>
    %40 = vector.broadcast %39 : vector<16x1xf32> to vector<16x256xf32>
    %41 = arith.addf %38, %40 : vector<16x256xf32>
    %c0_17 = arith.constant 0 : index
    %c0_18 = arith.constant 0 : index
    %42 = vector.load %arg6[%c0_17, %c0_18] : memref<16x1xf32, #tpu.memory_space<vmem>>, vector<16x1xf32>
    %c0_19 = arith.constant 0 : index
    %c0_20 = arith.constant 0 : index
    %43 = vector.load %arg7[%c0_19, %c0_20] : memref<16x1xf32, #tpu.memory_space<vmem>>, vector<16x1xf32>
    %cst_21 = arith.constant dense<0.000000e+00> : vector<16xf32>
    %44 = vector.multi_reduction <add>, %41, %cst_21 [1] : vector<16x256xf32> to vector<16xf32>
    %45 = vector.shape_cast %44 : vector<16xf32> to vector<16x1xf32>
    %46 = arith.mulf %41, %41 : vector<16x256xf32>
    %cst_22 = arith.constant dense<0.000000e+00> : vector<16xf32>
    %47 = vector.multi_reduction <add>, %46, %cst_22 [1] : vector<16x256xf32> to vector<16xf32>
    %48 = vector.shape_cast %47 : vector<16xf32> to vector<16x1xf32>
    %cst_23 = arith.constant dense<0.000000e+00> : vector<16x1xf32>
    %49 = tpu.matmul %2, %45, %cst_23 {dimension_numbers = #tpu.dot_dimension_numbers<[1], [0], [0], [1], [0, 0, 1, 1], [], []>} : vector<16x16xf32>, vector<16x1xf32>, vector<16x1xf32> -> vector<16x1xf32>
    %cst_24 = arith.constant dense<0.000000e+00> : vector<16x1xf32>
    %50 = tpu.matmul %2, %48, %cst_24 {dimension_numbers = #tpu.dot_dimension_numbers<[1], [0], [0], [1], [0, 0, 1, 1], [], []>} : vector<16x16xf32>, vector<16x1xf32>, vector<16x1xf32> -> vector<16x1xf32>
    %51 = arith.mulf %49, %49 : vector<16x1xf32>
    %52 = arith.subf %50, %51 : vector<16x1xf32>
    %cst_25 = arith.constant 9.99999974E-6 : f32
    %53 = vector.broadcast %cst_25 : f32 to vector<16x1xf32>
    %54 = arith.addf %52, %53 : vector<16x1xf32>
    %55 = math.rsqrt %54 : vector<16x1xf32>
    %56 = vector.broadcast %49 : vector<16x1xf32> to vector<16x256xf32>
    %57 = arith.subf %41, %56 : vector<16x256xf32>
    %58 = arith.mulf %55, %42 : vector<16x1xf32>
    %59 = vector.broadcast %58 : vector<16x1xf32> to vector<16x256xf32>
    %60 = arith.mulf %57, %59 : vector<16x256xf32>
    %61 = vector.broadcast %43 : vector<16x1xf32> to vector<16x256xf32>
    %62 = arith.addf %60, %61 : vector<16x256xf32>
    %cst_26 = arith.constant 0.000000e+00 : f32
    %63 = vector.broadcast %cst_26 : f32 to vector<16x256xf32>
    %64 = arith.maximumf %62, %63 : vector<16x256xf32>
    %c0_27 = arith.constant 0 : index
    %c0_28 = arith.constant 0 : index
    %65 = vector.load %arg2[%c0_27, %c0_28] : memref<9x256xf32, #tpu.memory_space<vmem>>, vector<1x256xf32>
    %c17_i32_29 = arith.constant 17 : i32
    %66 = tpu.dynamic_rotate %64 by %c17_i32_29 dim 1 : vector<16x256xf32>, i32 -> vector<16x256xf32>
    %67 = vector.broadcast %65 : vector<1x256xf32> to vector<16x256xf32>
    %68 = arith.mulf %66, %67 : vector<16x256xf32>
    %c1_30 = arith.constant 1 : index
    %c0_31 = arith.constant 0 : index
    %69 = vector.load %arg2[%c1_30, %c0_31] : memref<9x256xf32, #tpu.memory_space<vmem>>, vector<1x256xf32>
    %c16_i32_32 = arith.constant 16 : i32
    %70 = tpu.dynamic_rotate %64 by %c16_i32_32 dim 1 : vector<16x256xf32>, i32 -> vector<16x256xf32>
    %71 = vector.broadcast %69 : vector<1x256xf32> to vector<16x256xf32>
    %72 = arith.mulf %70, %71 : vector<16x256xf32>
    %c2_33 = arith.constant 2 : index
    %c0_34 = arith.constant 0 : index
    %73 = vector.load %arg2[%c2_33, %c0_34] : memref<9x256xf32, #tpu.memory_space<vmem>>, vector<1x256xf32>
    %c15_i32_35 = arith.constant 15 : i32
    %74 = tpu.dynamic_rotate %64 by %c15_i32_35 dim 1 : vector<16x256xf32>, i32 -> vector<16x256xf32>
    %75 = vector.broadcast %73 : vector<1x256xf32> to vector<16x256xf32>
    %76 = arith.mulf %74, %75 : vector<16x256xf32>
    %c3_36 = arith.constant 3 : index
    %c0_37 = arith.constant 0 : index
    %77 = vector.load %arg2[%c3_36, %c0_37] : memref<9x256xf32, #tpu.memory_space<vmem>>, vector<1x256xf32>
    %c1_i32_38 = arith.constant 1 : i32
    %78 = tpu.dynamic_rotate %64 by %c1_i32_38 dim 1 : vector<16x256xf32>, i32 -> vector<16x256xf32>
    %79 = vector.broadcast %77 : vector<1x256xf32> to vector<16x256xf32>
    %80 = arith.mulf %78, %79 : vector<16x256xf32>
    %c5_39 = arith.constant 5 : index
    %c0_40 = arith.constant 0 : index
    %81 = vector.load %arg2[%c5_39, %c0_40] : memref<9x256xf32, #tpu.memory_space<vmem>>, vector<1x256xf32>
    %c255_i32_41 = arith.constant 255 : i32
    %82 = tpu.dynamic_rotate %64 by %c255_i32_41 dim 1 : vector<16x256xf32>, i32 -> vector<16x256xf32>
    %83 = vector.broadcast %81 : vector<1x256xf32> to vector<16x256xf32>
    %84 = arith.mulf %82, %83 : vector<16x256xf32>
    %c6_42 = arith.constant 6 : index
    %c0_43 = arith.constant 0 : index
    %85 = vector.load %arg2[%c6_42, %c0_43] : memref<9x256xf32, #tpu.memory_space<vmem>>, vector<1x256xf32>
    %c241_i32_44 = arith.constant 241 : i32
    %86 = tpu.dynamic_rotate %64 by %c241_i32_44 dim 1 : vector<16x256xf32>, i32 -> vector<16x256xf32>
    %87 = vector.broadcast %85 : vector<1x256xf32> to vector<16x256xf32>
    %88 = arith.mulf %86, %87 : vector<16x256xf32>
    %c7_45 = arith.constant 7 : index
    %c0_46 = arith.constant 0 : index
    %89 = vector.load %arg2[%c7_45, %c0_46] : memref<9x256xf32, #tpu.memory_space<vmem>>, vector<1x256xf32>
    %c240_i32_47 = arith.constant 240 : i32
    %90 = tpu.dynamic_rotate %64 by %c240_i32_47 dim 1 : vector<16x256xf32>, i32 -> vector<16x256xf32>
    %91 = vector.broadcast %89 : vector<1x256xf32> to vector<16x256xf32>
    %92 = arith.mulf %90, %91 : vector<16x256xf32>
    %c8_48 = arith.constant 8 : index
    %c0_49 = arith.constant 0 : index
    %93 = vector.load %arg2[%c8_48, %c0_49] : memref<9x256xf32, #tpu.memory_space<vmem>>, vector<1x256xf32>
    %c239_i32_50 = arith.constant 239 : i32
    %94 = tpu.dynamic_rotate %64 by %c239_i32_50 dim 1 : vector<16x256xf32>, i32 -> vector<16x256xf32>
    %95 = vector.broadcast %93 : vector<1x256xf32> to vector<16x256xf32>
    %96 = arith.mulf %94, %95 : vector<16x256xf32>
    %97 = tpu.concatenate %68, %72, %76, %80, %64, %84, %88, %92, %96 in 0 : vector<16x256xf32>, vector<16x256xf32>, vector<16x256xf32>, vector<16x256xf32>, vector<16x256xf32>, vector<16x256xf32>, vector<16x256xf32>, vector<16x256xf32>, vector<16x256xf32> -> vector<144x256xf32>
    %98 = arith.truncf %97 : vector<144x256xf32> to vector<144x256xbf16>
    %c0_51 = arith.constant 0 : index
    %c0_52 = arith.constant 0 : index
    %99 = vector.load %arg8[%c0_51, %c0_52] : memref<16x144xbf16, #tpu.memory_space<vmem>>, vector<16x144xbf16>
    %cst_53 = arith.constant dense<0.000000e+00> : vector<16x256xf32>
    %100 = tpu.matmul %99, %98, %cst_53 {dimension_numbers = #tpu.dot_dimension_numbers<[1], [0], [0], [1], [0, 0, 1, 1], [], []>} : vector<16x144xbf16>, vector<144x256xbf16>, vector<16x256xf32> -> vector<16x256xf32>
    %c0_54 = arith.constant 0 : index
    %c0_55 = arith.constant 0 : index
    %101 = vector.load %arg9[%c0_54, %c0_55] : memref<16x1xf32, #tpu.memory_space<vmem>>, vector<16x1xf32>
    %102 = vector.broadcast %101 : vector<16x1xf32> to vector<16x256xf32>
    %103 = arith.addf %100, %102 : vector<16x256xf32>
    %c0_56 = arith.constant 0 : index
    %c0_57 = arith.constant 0 : index
    %104 = vector.load %arg10[%c0_56, %c0_57] : memref<16x1xf32, #tpu.memory_space<vmem>>, vector<16x1xf32>
    %c0_58 = arith.constant 0 : index
    %c0_59 = arith.constant 0 : index
    %105 = vector.load %arg11[%c0_58, %c0_59] : memref<16x1xf32, #tpu.memory_space<vmem>>, vector<16x1xf32>
    %cst_60 = arith.constant dense<0.000000e+00> : vector<16xf32>
    %106 = vector.multi_reduction <add>, %103, %cst_60 [1] : vector<16x256xf32> to vector<16xf32>
    %107 = vector.shape_cast %106 : vector<16xf32> to vector<16x1xf32>
    %108 = arith.mulf %103, %103 : vector<16x256xf32>
    %cst_61 = arith.constant dense<0.000000e+00> : vector<16xf32>
    %109 = vector.multi_reduction <add>, %108, %cst_61 [1] : vector<16x256xf32> to vector<16xf32>
    %110 = vector.shape_cast %109 : vector<16xf32> to vector<16x1xf32>
    %cst_62 = arith.constant dense<0.000000e+00> : vector<16x1xf32>
    %111 = tpu.matmul %2, %107, %cst_62 {dimension_numbers = #tpu.dot_dimension_numbers<[1], [0], [0], [1], [0, 0, 1, 1], [], []>} : vector<16x16xf32>, vector<16x1xf32>, vector<16x1xf32> -> vector<16x1xf32>
    %cst_63 = arith.constant dense<0.000000e+00> : vector<16x1xf32>
    %112 = tpu.matmul %2, %110, %cst_63 {dimension_numbers = #tpu.dot_dimension_numbers<[1], [0], [0], [1], [0, 0, 1, 1], [], []>} : vector<16x16xf32>, vector<16x1xf32>, vector<16x1xf32> -> vector<16x1xf32>
    %113 = arith.mulf %111, %111 : vector<16x1xf32>
    %114 = arith.subf %112, %113 : vector<16x1xf32>
    %cst_64 = arith.constant 9.99999974E-6 : f32
    %115 = vector.broadcast %cst_64 : f32 to vector<16x1xf32>
    %116 = arith.addf %114, %115 : vector<16x1xf32>
    %117 = math.rsqrt %116 : vector<16x1xf32>
    %118 = vector.broadcast %111 : vector<16x1xf32> to vector<16x256xf32>
    %119 = arith.subf %103, %118 : vector<16x256xf32>
    %120 = arith.mulf %117, %104 : vector<16x1xf32>
    %121 = vector.broadcast %120 : vector<16x1xf32> to vector<16x256xf32>
    %122 = arith.mulf %119, %121 : vector<16x256xf32>
    %123 = vector.broadcast %105 : vector<16x1xf32> to vector<16x256xf32>
    %124 = arith.addf %122, %123 : vector<16x256xf32>
    %c0_65 = arith.constant 0 : index
    %c0_66 = arith.constant 0 : index
    %125 = vector.load %arg12[%c0_65, %c0_66] : memref<16x8xbf16, #tpu.memory_space<vmem>>, vector<16x8xbf16>
    %126 = arith.truncf %1 : vector<8x256xf32> to vector<8x256xbf16>
    %cst_67 = arith.constant dense<0.000000e+00> : vector<16x256xf32>
    %127 = tpu.matmul %125, %126, %cst_67 {dimension_numbers = #tpu.dot_dimension_numbers<[1], [0], [0], [1], [0, 0, 1, 1], [], []>} : vector<16x8xbf16>, vector<8x256xbf16>, vector<16x256xf32> -> vector<16x256xf32>
    %c0_68 = arith.constant 0 : index
    %c0_69 = arith.constant 0 : index
    %128 = vector.load %arg13[%c0_68, %c0_69] : memref<16x1xf32, #tpu.memory_space<vmem>>, vector<16x1xf32>
    %129 = vector.broadcast %128 : vector<16x1xf32> to vector<16x256xf32>
    %130 = arith.addf %127, %129 : vector<16x256xf32>
    %131 = arith.addf %124, %130 : vector<16x256xf32>
    %cst_70 = arith.constant 0.000000e+00 : f32
    %132 = vector.broadcast %cst_70 : f32 to vector<16x256xf32>
    %133 = arith.maximumf %131, %132 : vector<16x256xf32>
    %c0_71 = arith.constant 0 : index
    %c0_72 = arith.constant 0 : index
    %c0_73 = arith.constant 0 : index
    %134 = vector.load %arg14[%c0_71, %c0_72, %c0_73] : memref<1x16x256xf32, #tpu.memory_space<vmem>>, vector<1x16x256xf32>
    %135 = vector.shape_cast %134 : vector<1x16x256xf32> to vector<16x256xf32>
    %136 = vector.shape_cast %133 : vector<16x256xf32> to vector<1x16x256xf32>
    tpu.vector_store %arg14[%c0_71, %c0_72, %c0_73], %136 {strides = array<i32>} : memref<1x16x256xf32, #tpu.memory_space<vmem>>, vector<1x16x256xf32>,
    return
  }
  func.func @transform_0(%arg0: i32) -> (i32, i32, i32) {
    %c0_i32 = arith.constant 0 : i32
    %c0_i32_0 = arith.constant 0 : i32
    %c0_i32_1 = arith.constant 0 : i32
    return %arg0, %c0_i32, %c0_i32_0 : i32, i32, i32
  }
  func.func @transform_1(%arg0: i32) -> (i32, i32) {
    %c0_i32 = arith.constant 0 : i32
    %c0_i32_0 = arith.constant 0 : i32
    %c0_i32_1 = arith.constant 0 : i32
    return %c0_i32, %c0_i32_0 : i32, i32
  }
  func.func @transform_2(%arg0: i32) -> (i32, i32) {
    %c0_i32 = arith.constant 0 : i32
    %c0_i32_0 = arith.constant 0 : i32
    %c0_i32_1 = arith.constant 0 : i32
    return %c0_i32, %c0_i32_0 : i32, i32
  }
  func.func @transform_3(%arg0: i32) -> (i32, i32) {
    %c0_i32 = arith.constant 0 : i32
    %c0_i32_0 = arith.constant 0 : i32
    %c0_i32_1 = arith.constant 0 : i32
    return %c0_i32, %c0_i32_0 : i32, i32
  }
  func.func @transform_4(%arg0: i32) -> (i32, i32) {
    %c0_i32 = arith.constant 0 : i32
    %c0_i32_0 = arith.constant 0 : i32
    %c0_i32_1 = arith.constant 0 : i32
    return %c0_i32, %c0_i32_0 : i32, i32
  }
  func.func @transform_5(%arg0: i32) -> (i32, i32) {
    %c0_i32 = arith.constant 0 : i32
    %c0_i32_0 = arith.constant 0 : i32
    %c0_i32_1 = arith.constant 0 : i32
    return %c0_i32, %c0_i32_0 : i32, i32
  }
  func.func @transform_6(%arg0: i32) -> (i32, i32) {
    %c0_i32 = arith.constant 0 : i32
    %c0_i32_0 = arith.constant 0 : i32
    %c0_i32_1 = arith.constant 0 : i32
    return %c0_i32, %c0_i32_0 : i32, i32
  }
  func.func @transform_7(%arg0: i32) -> (i32, i32) {
    %c0_i32 = arith.constant 0 : i32
    %c0_i32_0 = arith.constant 0 : i32
    %c0_i32_1 = arith.constant 0 : i32
    return %c0_i32, %c0_i32_0 : i32, i32
  }
  func.func @transform_8(%arg0: i32) -> (i32, i32) {
    %c0_i32 = arith.constant 0 : i32
    %c0_i32_0 = arith.constant 0 : i32
    %c0_i32_1 = arith.constant 0 : i32
    return %c0_i32, %c0_i32_0 : i32, i32
  }
  func.func @transform_9(%arg0: i32) -> (i32, i32) {
    %c0_i32 = arith.constant 0 : i32
    %c0_i32_0 = arith.constant 0 : i32
    %c0_i32_1 = arith.constant 0 : i32
    return %c0_i32, %c0_i32_0 : i32, i32
  }
  func.func @transform_10(%arg0: i32) -> (i32, i32) {
    %c0_i32 = arith.constant 0 : i32
    %c0_i32_0 = arith.constant 0 : i32
    %c0_i32_1 = arith.constant 0 : i32
    return %c0_i32, %c0_i32_0 : i32, i32
  }
  func.func @transform_11(%arg0: i32) -> (i32, i32) {
    %c0_i32 = arith.constant 0 : i32
    %c0_i32_0 = arith.constant 0 : i32
    %c0_i32_1 = arith.constant 0 : i32
    return %c0_i32, %c0_i32_0 : i32, i32
  }
  func.func @transform_12(%arg0: i32) -> (i32, i32) {
    %c0_i32 = arith.constant 0 : i32
    %c0_i32_0 = arith.constant 0 : i32
    %c0_i32_1 = arith.constant 0 : i32
    return %c0_i32, %c0_i32_0 : i32, i32
  }
  func.func @transform_13(%arg0: i32) -> (i32, i32, i32) {
    %c0_i32 = arith.constant 0 : i32
    %c0_i32_0 = arith.constant 0 : i32
    %c0_i32_1 = arith.constant 0 : i32
    return %arg0, %c0_i32, %c0_i32_0 : i32, i32, i32
  }
}

</mosaic_0001>

<bundles_post_ra>
// kernel: tpu_custom_call.1
= control target key start
LH: loop header
LB: loop body
LE: loop exit
PB: predicated region body
PF: predicated region fallthrough
CT: control target
= control target key end

     0   :  { %s2423_s0 = inlined_call_operand.vmem [shape: f32[2,8,256], index: 0, kind: input, shape index: {}]   ;;  %s2424_s1 = inlined_call_operand.vmem [shape: f32[9,256], index: 1, kind: input, shape index: {}]   ;;  %s2425_s2 = inlined_call_operand.vmem [shape: f32[16,16], index: 2, kind: input, shape index: {}]   ;;  %s2426_s3 = inlined_call_operand.vmem [shape: bf16[16,72], index: 3, kind: input, shape index: {}]   ;;  %s2427_s4 = inlined_call_operand.vmem [shape: f32[16,1], index: 4, kind: input, shape index: {}]   ;;  %s2428_s5 = inlined_call_operand.vmem [shape: f32[16,1], index: 5, kind: input, shape index: {}]   ;;  %s2429_s6 = inlined_call_operand.vmem [shape: f32[16,1], index: 6, kind: input, shape index: {}]   ;;  %s2430_s7 = inlined_call_operand.vmem [shape: bf16[16,144], index: 7, kind: input, shape index: {}]   ;;  %s2431_s8 = inlined_call_operand.vmem [shape: f32[16,1], index: 8, kind: input, shape index: {}]   ;;  %s2432_s9 = inlined_call_operand.vmem [shape: f32[16,1], index: 9, kind: input, shape index: {}]   ;;  %s2433_s10 = inlined_call_operand.vmem [shape: f32[16,1], index: 10, kind: input, shape index: {}]   ;;  %s2434_s11 = inlined_call_operand.vmem [shape: bf16[16,8], index: 11, kind: input, shape index: {}]   ;;  %s2435_s12 = inlined_call_operand.vmem [shape: f32[16,1], index: 12, kind: input, shape index: {}]   ;;  %s2436_s13 = inlined_call_operand.hbm [shape: f32[2,16,256], index: 13, kind: output, shape index: {}]  }
   0x1   :  { %2453 = sst [smem:[#allocation5_spill]] %s2423_s0 }
   0x2   :  { %2454 = sst [smem:[#allocation6_spill]] %s2424_s1 }
   0x3   :  { %2455 = sst [smem:[#allocation7_spill]] %s2425_s2 }
   0x4   :  { %2456 = sst [smem:[#allocation8_spill]] %s2426_s3 }
   0x5   :  { %18 = vsyncpa [#allocation3], 0 }
   0x6   :  { %20 = vsyncpa [#allocation3 + $0x1], 0  ;;  %s1825_s25 = smov 0   ;;  %s1827_s26 = smov 0  }
   0x7   :  { %s1829_s27 = smov 0   ;;  %s1831_s28 = smov 0  }
   0x8 LB: > { %s1846_s29 = sadd.s32 4294967295, %s1742_s28   ;;  %s1536_s30 = sadd.s32 4294967294, %s1742_s28   ;;  %s1742_s28 = sphi %s1831_s28, %s2474_s28   ;;  %s1738_s27 = sphi %s1829_s27, %s2473_s27   ;;  %s1734_s26 = sphi %s1827_s26, %s2472_s26   ;;  %s1730_s25 = sphi %s1825_s25, %s2471_s25  }
   0x9   : > { %s1850_s14 = sadd.s32 1, %s1742_s28   ;;  %s311_s15 = sadd.s32 1, %s1738_s27 }
   0xa   : > { %s308_s16 = ssub.s32 %s1742_s28, %s1850_s14  ;;  %p321_p0 = scmp.ne.s32.totalorder %s1738_s27, %s1734_s26 }
   0xb   : > { %p309_p1 = scmp.eq.s32.totalorder %s308_s16, 0  ;;  %p322_p2 = scmp.eq.s32.totalorder %s1846_s29, 1 }
   0xc   : > { %p327_p3 = scmp.ne.s32.totalorder %s1734_s26, %s1730_s25  ;;  %p328_p4 = scmp.eq.s32.totalorder %s1536_s30, 1 }
   0xd   : > { %s1861_s17 = scalar_select %p309_p1, %s1738_s27, %s311_s15  }
   0xe   : > { %p1863_p5 = por %p322_p2, %p321_p0  ;;  %p1867_p6 = por %p328_p4, %p327_p3 }
   0xf   : > { %p1539_p7 = scmp.ge.s32.totalorder %s1742_s28, 1  ;;  %p390_p8 = scmp.lt.s32.totalorder %s1742_s28, 3 }
  0x11   : > { %p391_p9 = pnand %p1539_p7, %p390_p8 }
  0x12   : > { %p434_p10 = scmp.lt.s32.totalorder (!%p391_p9), %s1846_s29, 1  ;;  %s2459_s0 = sld [smem:[#allocation5_spill]] (!%p391_p9) }
  0x13   : > { %394 = sbr.rel (%p391_p9) target bundleno = 1771 (0x6eb), region = 72  ;;  %s2449_s30 = smov (!%p391_p9), 113  }
  0x14   : > { %s2437_s15 = smov (!%p391_p9), 111   ;;  %s2451_s16 = smov (!%p391_p9), 112  }
  0x15   : > { %s2441_s22 = smov (!%p391_p9), 1   ;;  %s2445_s23 = smov (!%p391_p9), 17  }
  0x16   : > { %s2460_s1 = sld [smem:[#allocation6_spill]] (!%p391_p9) }
  0x17   : > { %s2461_s3 = sld [smem:[#allocation8_spill]] (!%p391_p9) }
  0x18   : > { %s435_s20 = scalar_select %p434_p10, %s1846_s29, 1  ;;  %v1750_v2 = vmov 0   ;;  %v633_v3 = vld [vmem:[%s2427_s4] sm:$0xff]  ;;  %v634_v4 = vld [vmem:[%s2427_s4 + $0x8] sm:$0xff]  ;;  %v449_v5 = vlaneseq  ;;  %vm654_vm3 = vcmask 1043456   ;;  %vm650_vm9 = vcmask 588800  }
  0x19   : > { %693 = vmatprep.mubr.bf16.mxu0 %v1750_v2  ;;  %1668 = vset.pattern.permute.xlu1 %v1750_v2  ;;  %s2462_s2 = sld [smem:[#allocation7_spill]]  ;;  %vm724_vm10 = vcmask 130048   ;;  %vm1395_vm11 = vcmask 64512  }
  0x1a   : > { %s1572_s21 = sshll.u32 %s435_s20, 4  ;;  %s2443_s20 = smov 127   ;;  %1667 = vset.pattern.permute.xlu0 %v1750_v2  ;;  %v456_v6 = vshrl.u32 %v449_v5, 7  ;;  %v1923_v7 = vand.u32 127, %v449_v5 }
  0x1b   : > { %s438_s24 = scalar_lea.vmem %s2459_s0, %s1572_s21  ;;  %s2439_s21 = smov 15  }
  0x1c   : > { %v1878_v0 = vld [vmem:[%s438_s24] sm:$0xff]  ;;  %v1884_v1 = vld [vmem:[%s438_s24 + $0x8] sm:$0xff]  ;;  %s2447_s24 = smov 16   ;;  %v1925_v8 = vsub.s32 0, %v456_v6  ;;  %v1927_v9 = vsub.s32 1, %v456_v6  ;;  %vm605_vm0 = vcmp.lt.s32.totalorder %v1923_v7, 111 }
  0x1d   : > { %557 = vrot.lane.b32.xlu1 %v1878_v0, %s2449_s30  ;;  %601 = vrot.lane.b32.xlu0 %v1878_v0, %s2437_s15  ;;  %v1549_v10 = vld [vmem:[%s2460_s1 + $0x10] ss:$8 sm:$0x3]  ;;  %v1547_v13 = vld [vmem:[%s2460_s1 + $0x6] ss:$8 sm:$0x3] }
  0x1e   : > { %v1937_v14 = vrot.slane %v1549_v10, %v1925_v8  ;;  %v1548_v15 = vld [vmem:[%s2460_s1 + $0x7] ss:$8 sm:$0x3]  ;;  %v1943_v16 = vrot.slane %v1549_v10, %v1927_v9  ;;  %vm561_vm1 = vcmp.lt.s32.totalorder %v1923_v7, 113  ;;  %v1947_v17 = vrot.slane %v1547_v13, %v1925_v8 }
  0x1f   : > { %vm583_vm2 = vcmp.lt.s32.totalorder %v1923_v7, 112  ;;  %v1951_v20 = vrot.slane %v1547_v13, %v1927_v9  ;;  %v1958_v23 = vrot.slane %v1548_v15, %v1925_v8  ;;  %v1546_v24 = vld [vmem:[%s2460_s1 + $0x5] ss:$8 sm:$0x3]  ;;  %v1967_v27 = vrot.slane %v1548_v15, %v1927_v9 }
  0x20   : > { %vm539_vm4 = vcmp.lt.s32.totalorder %v1923_v7, 127  ;;  %v1974_v34 = vrot.slane %v1546_v24, %v1925_v8  ;;  %v1982_v38 = vrot.slane %v1546_v24, %v1927_v9  ;;  %v1544_v51 = vld [vmem:[%s2460_s1 + $0x2] ss:$8 sm:$0x3]  ;;  %vm495_vm5 = vcmp.lt.s32.totalorder %v1923_v7, 15 }
  0x21   : > { %559 = vrot.lane.b32.xlu1 %v1884_v1, %s2449_s30  ;;  %603 = vrot.lane.b32.xlu0 %v1884_v1, %s2437_s15  ;;  %v1545_v52 = vld [vmem:[%s2460_s1 + $0x3] ss:$8 sm:$0x3]  ;;  %v2005_v57 = vrot.slane %v1544_v51, %v1925_v8  ;;  %v2008_v58 = vrot.slane %v1544_v51, %v1927_v9  ;;  %vm517_vm6 = vcmp.lt.s32.totalorder %v1923_v7, 1  ;;  %vm451_vm7 = vcmp.lt.s32.totalorder %v1923_v7, 17  ;;  %s2463_s30 = smov 112  }
  0x22   : > { %v2012_v59 = vrot.slane %v1545_v52, %v1925_v8  ;;  %v2015_v60 = vrot.slane %v1545_v52, %v1927_v9  ;;  %v444_v13 = vld [vmem:[%s2460_s1] ss:$8 sm:$0x3]  ;;  %v1543_v15 = vld [vmem:[%s2460_s1 + $0x1] ss:$8 sm:$0x3] }
  0x23   : > { %v2037_v24 = vrot.slane %v444_v13, %v1925_v8  ;;  %vm473_vm8 = vcmp.lt.s32.totalorder %v1923_v7, 16  ;;  %s2469_s15 = smov 17   ;;  %s1753_s1 = smov [#allocation2]  }
  0x25   : > { %581 = vrot.lane.b32.xlu1 %v1884_v1, %s2451_s16  ;;  %579 = vrot.lane.b32.xlu0 %v1878_v0, %s2451_s16  ;;  %s2464_s16 = smov 113  }
  0x29   : > { %537 = vrot.lane.b32.xlu1 %v1884_v1, %s2443_s20  ;;  %535 = vrot.lane.b32.xlu0 %v1878_v0, %s2443_s20  ;;  %s2465_s20 = smov 127  }
  0x2d   : > { %493 = vrot.lane.b32.xlu1 %v1884_v1, %s2439_s21  ;;  %491 = vrot.lane.b32.xlu0 %v1878_v0, %s2439_s21 }
  0x31   : > { %515 = vrot.lane.b32.xlu1 %v1884_v1, %s2441_s22  ;;  %513 = vrot.lane.b32.xlu0 %v1878_v0, %s2441_s22  ;;  %s2466_s22 = smov 1  }
  0x35   : > { %447 = vrot.lane.b32.xlu1 %v1884_v1, %s2445_s23  ;;  %445 = vrot.lane.b32.xlu0 %v1878_v0, %s2445_s23  ;;  %s2467_s23 = smov 15  }
  0x39   : > { %471 = vrot.lane.b32.xlu1 %v1884_v1, %s2447_s24  ;;  %469 = vrot.lane.b32.xlu0 %v1878_v0, %s2447_s24  ;;  %s2468_s24 = smov 16  }
  0x3d   : > { %637 = vperm.xlu1 %1668, %v633_v3   ;;  %642 = vperm.xlu0 %1667, %v634_v4  }
  0x8f   : > { %v558_v11 = vpop.permute.xlu1 %557  ;;  %v602_v12 = vpop.permute.xlu0 %601 }
  0x93   : > { %v560_v18 = vpop.permute.xlu1 %559  ;;  %v604_v19 = vpop.permute.xlu0 %603 }
  0x94   : > { %v606_v21 = vsel %vm605_vm0, %v602_v12, %v604_v19  ;;  %v607_v22 = vsel %vm605_vm0, %v604_v19, %v602_v12  ;;  %v562_v25 = vsel %vm561_vm1, %v558_v11, %v560_v18  ;;  %v563_v29 = vsel %vm561_vm1, %v560_v18, %v558_v11 }
  0x95   : > { %v619_v26 = vmul.f32 %v1937_v14, %v606_v21  ;;  %v620_v28 = vmul.f32 %v1943_v16, %v607_v22  ;;  %v575_v35 = vmul.f32 %v1947_v17, %v562_v25  ;;  %v576_v39 = vmul.f32 %v1951_v20, %v563_v29 }
  0x96   : > { %v2040_v25 = vrot.slane %v444_v13, %v1927_v9 }
  0x97   : > { %v582_v30 = vpop.permute.xlu1 %581  ;;  %v580_v31 = vpop.permute.xlu0 %579  ;;  %v630_v32 = vpack.c.bf16 %v620_v28, %v620_v28  ;;  %v629_v33 = vpack.c.bf16 %v619_v26, %v619_v26  ;;  %v2044_v26 = vrot.slane %v1543_v15, %v1925_v8  ;;  %v2047_v28 = vrot.slane %v1543_v15, %v1927_v9 }
  0x98   : > { %v584_v36 = vsel %vm583_vm2, %v580_v31, %v582_v30  ;;  %v585_v37 = vsel %vm583_vm2, %v582_v30, %v580_v31 }
  0x99   : > { %v597_v40 = vmul.f32 %v1958_v23, %v584_v36  ;;  %v598_v41 = vmul.f32 %v1967_v27, %v585_v37  ;;  %1551 = vmatprep.subr.msk.bf16.mxu0 %vm654_vm3, %v630_v32  ;;  %v656_v42 = vsel %vm654_vm3, %v629_v33, 0 }
  0x9a   : > { %668 = vmatpush1.bf16.msra.mxu0 %v656_v42 }
  0x9b   : > { %v538_v43 = vpop.permute.xlu1 %537  ;;  %v536_v44 = vpop.permute.xlu0 %535  ;;  %v628_v45 = vpack.c.bf16 %v598_v41, %v576_v39  ;;  %v627_v46 = vpack.c.bf16 %v597_v40, %v575_v35  ;;  %v1669_v41 = vld [vmem:[%s2461_s3] sm:$0xff]  }
  0x9c   : > { %v540_v47 = vsel %vm539_vm4, %v536_v44, %v538_v43  ;;  %v541_v48 = vsel %vm539_vm4, %v538_v43, %v536_v44 }
  0x9d   : > { %v553_v49 = vmul.f32 %v1974_v34, %v540_v47  ;;  %v554_v50 = vmul.f32 %v1982_v38, %v541_v48  ;;  %669 = vmatprep.subr.bf16.mxu0 %v628_v45 }
  0x9e   : > { %670 = vmatpush1.bf16.msra.mxu0 %v627_v46 }
  0x9f   : > { %v494_v53 = vpop.permute.xlu1 %493  ;;  %v492_v54 = vpop.permute.xlu0 %491  ;;  %v626_v55 = vpack.c.bf16 %v554_v50, %v1884_v1  ;;  %v625_v56 = vpack.c.bf16 %v553_v49, %v1878_v0 }
  0xa0   : > { %v496_v61 = vsel %vm495_vm5, %v492_v54, %v494_v53  ;;  %v497_v62 = vsel %vm495_vm5, %v494_v53, %v492_v54 }
  0xa1   : > { %671 = vmatprep.subr.bf16.mxu0 %v626_v55  ;;  %v509_v6 = vmul.f32 %v2005_v57, %v497_v62  ;;  %v510_v10 = vmul.f32 %v2008_v58, %v496_v61 }
  0xa2   : > { %672 = vmatpush1.bf16.msra.mxu0 %v625_v56 }
  0xa3   : > { %v516_v63 = vpop.permute.xlu1 %515  ;;  %v514_v3 = vpop.permute.xlu0 %513 }
  0xa4   : > { %v518_v4 = vsel %vm517_vm6, %v514_v3, %v516_v63  ;;  %v519_v5 = vsel %vm517_vm6, %v516_v63, %v514_v3  ;;  %v2087_v3 = vld [vmem:[%s2462_s2] sm:$0xff] }
  0xa5   : > { %v531_v11 = vmul.f32 %v2012_v59, %v519_v5  ;;  %v532_v12 = vmul.f32 %v2015_v60, %v518_v4  ;;  %1601 = vmatprep.mubr.msk.f32.mxu1 %vm724_vm10, %v2087_v3 }
  0xa7   : > { %v448_v18 = vpop.permute.xlu1 %447  ;;  %v446_v19 = vpop.permute.xlu0 %445  ;;  %v624_v21 = vpack.c.bf16 %v532_v12, %v510_v10  ;;  %v623_v22 = vpack.c.bf16 %v531_v11, %v509_v6  ;;  %v2096_v10 = vld [vmem:[%s2462_s2 + $0x8] sm:$0xff]  ;;  %s1686_s2 = sshll.u32 %s1753_s1, 4  ;;  %s1687_s2 = int_to_ptr.vmem [resolvable:$false] %s1686_s2 }
  0xa8   : > { %v452_v29 = vsel %vm451_vm7, %v446_v19, %v448_v18  ;;  %v453_v30 = vsel %vm451_vm7, %v448_v18, %v446_v19  ;;  %s1688_s3 = scalar_lea.vmem %s1687_s2, 1024 }
  0xa9   : > { %673 = vmatprep.subr.bf16.mxu0 %v624_v21  ;;  %v465_v8 = vmul.f32 %v2037_v24, %v453_v30  ;;  %v466_v9 = vmul.f32 %v2040_v25, %v452_v29 }
  0xaa   : > { %674 = vmatpush1.bf16.msra.mxu0 %v623_v22 }
  0xab   : > { %v472_v31 = vpop.permute.xlu1 %471  ;;  %v470_v32 = vpop.permute.xlu0 %469 }
  0xac   : > { %v474_v33 = vsel %vm473_vm8, %v470_v32, %v472_v31  ;;  %v475_v35 = vsel %vm473_vm8, %v472_v31, %v470_v32  ;;  %v705_v32 = vld [vmem:[%s2428_s5 + $0x8] sm:$0xff] }
  0xad   : > { %v487_v36 = vmul.f32 %v2044_v26, %v475_v35  ;;  %v488_v37 = vmul.f32 %v2047_v28, %v474_v33  ;;  %v704_v35 = vld [vmem:[%s2428_s5] sm:$0xff] }
  0xaf   : > { %v622_v39 = vpack.c.bf16 %v488_v37, %v466_v9  ;;  %v621_v40 = vpack.c.bf16 %v487_v36, %v465_v8  ;;  %v707_v37 = vld [vmem:[%s2429_s6 + $0x8] sm:$0xff] }
  0xb1   : > { %675 = vmatprep.subr.bf16.mxu0 %v622_v39  ;;  %v706_v39 = vld [vmem:[%s2429_s6] sm:$0xff] }
  0xb2   : > { %676 = vmatpush1.bf16.msra.mxu0 %v621_v40 }
  0xb5   : > { %1552 = vmatmul.mubr.msk.bf16.vlgmr.msra.gmra.mxu0 %vm650_vm9, %v1669_v41 }
  0xb6   : > { %1594 = vmatprep.mubr.msk.f32.mxu0 %vm724_vm10, %v2087_v3 }
  0xb8   : > { %v638_v42 = vpop.permute.xlu1 %637  ;;  %v643_v45 = vpop.permute.xlu0 %642 }
 0x175   : > { %v695_v43 = vpop.f32.mrf.mxu0 }
 0x176   : > { %v2064_v46 = vadd.f32 %v695_v43, %v638_v42 }
 0x177   : > { %v697_v44 = vpop.f32.mrf.mxu0 }
 0x178   : > { %v2066_v47 = vadd.f32 %v697_v44, %v638_v42  ;;  %v714_v62 = vmul.f32 %v2064_v46, %v2064_v46 }
 0x179   : > { %v699_v48 = vpop.f32.mrf.mxu0 }
 0x17a   : > { %v2068_v49 = vadd.f32 %v699_v48, %v643_v45  ;;  %v708_v50 = vadd.f32 %v2066_v47, %v2064_v46  ;;  %v715_v56 = vmul.f32 %v2066_v47, %v2066_v47 }
 0x17b   : > { %v701_v51 = vpop.f32.mrf.mxu0 }
 0x17c   : > { %v2072_v52 = vadd.f32 %v701_v51, %v643_v45  ;;  %709 = vadd.xlane.f32.xlu0 %v708_v50  ;;  %v716_v54 = vmul.f32 %v2068_v49, %v2068_v49  ;;  %v718_v63 = vadd.f32 %v715_v56, %v714_v62 }
 0x17e   : > { %v711_v53 = vadd.f32 %v2072_v52, %v2068_v49  ;;  %v717_v55 = vmul.f32 %v2072_v52, %v2072_v52 }
 0x180   : > { %712 = vadd.xlane.f32.xlu1 %v711_v53  ;;  %v721_v61 = vadd.f32 %v717_v55, %v716_v54 }
 0x182   : > { %722 = vadd.xlane.f32.xlu0 %v721_v61 }
 0x184   : > { %719 = vadd.xlane.f32.xlu1 %v718_v63 }
 0x205   : > { %v710_v4 = vpop.xlane.xlu0 %709 }
 0x209   : > { %v713_v5 = vpop.xlane.xlu1 %712 }
 0x20a   : > { %1590 = vmatprep.subr.mxu0 %v713_v5 }
 0x20b   : > { %1591 = vmatpush3.msra.mxu0 %v713_v5  ;;  %v723_v6 = vpop.xlane.xlu0 %722 }
 0x20c   : > { %1592 = vmatprep.subr.mxu0 %v710_v4  ;;  %1597 = vmatprep.subr.mxu1 %v723_v6 }
 0x20d   : > { %v720_v11 = vpop.xlane.xlu1 %719  ;;  %1593 = vmatpush3.msra.mxu0 %v710_v4  ;;  %1598 = vmatpush3.msra.mxu1 %v723_v6 }
 0x20e   : > { %1595 = vmatmul.mubr.msk.f32.vlgmr.msra.gmra.mxu0 %vm724_vm10, %v2096_v10  ;;  %1599 = vmatprep.subr.mxu1 %v720_v11 }
 0x20f   : > { %1600 = vmatpush3.msra.mxu1 %v720_v11  ;;  %1608 = vmatprep.mubr.msk.f32.mxu0 %vm724_vm10, %v2087_v3 }
 0x210   : > { %1602 = vmatmul.mubr.msk.f32.vlgmr.msra.gmra.mxu1 %vm724_vm10, %v2096_v10 }
 0x2ce   : > { %v1596_v12 = vpop.f32.mrf.mxu0 }
 0x2cf   : > { %v882_v13 = vmul.f32 %v1596_v12, %v1596_v12  ;;  %896 = vperm.xlu1 %1668, %v1596_v12   ;;  %v1670_v12 = vld [vmem:[%s2430_s7 + $0x4] ss:$8 sps:$4 sm:$0xff]  }
 0x2d0   : > { %v797_v15 = vpop.f32.mrf.mxu0  ;;  %v1603_v18 = vpop.f32.mrf.mxu1  ;;  %1559 = vmatprep.mubr.msk.bf16.mxu1 %vm724_vm10, %v1670_v12 }
 0x2d1   : > { %v881_v19 = vmul.f32 %v797_v15, %v797_v15  ;;  %v884_v21 = vsub.f32 %v1603_v18, %v882_v13  ;;  %891 = vperm.xlu0 %1667, %v797_v15   ;;  %v1085_v13 = vld [vmem:[%s2431_s8] sm:$0xff]  ;;  %v1086_v15 = vld [vmem:[%s2431_s8 + $0x8] sm:$0xff] }
 0x2d2   : > { %v872_v22 = vpop.f32.mrf.mxu1 }
 0x2d3   : > { %v886_v29 = vadd.f32 1e-05, %v884_v21  ;;  %v883_v30 = vsub.f32 %v872_v22, %v881_v19 }
 0x2d5   : > { %1674 = vrsqrt.f32 %v886_v29  ;;  %v885_v31 = vadd.f32 1e-05, %v883_v30 }
 0x2d7   : > { %1676 = vrsqrt.f32 %v885_v31 }
 0x2e2   : > { %v1675_v33 = vpop.eup %1674 }
 0x2e3   : > { %v904_v8 = vmul.f32 %v1675_v33, %v705_v32 }
 0x2e4   : > { %v1677_v9 = vpop.eup %1676 }
 0x2e5   : > { %912 = vperm.xlu0 %1667, %v904_v8   ;;  %v903_v36 = vmul.f32 %v1677_v9, %v704_v35 }
 0x2e7   : > { %907 = vperm.xlu1 %1668, %v903_v36  }
 0x2e9   : > { %926 = vperm.xlu0 %1667, %v707_v37  }
 0x2eb   : > { %921 = vperm.xlu1 %1668, %v706_v39  }
 0x34a   : > { %v897_v41 = vpop.permute.xlu1 %896 }
 0x34b   : > { %v901_v43 = vsub.f32 %v2068_v49, %v897_v41  ;;  %v902_v44 = vsub.f32 %v2072_v52, %v897_v41 }
 0x34c   : > { %v892_v40 = vpop.permute.xlu0 %891 }
 0x34d   : > { %v899_v48 = vsub.f32 %v2064_v46, %v892_v40  ;;  %v900_v50 = vsub.f32 %v2066_v47, %v892_v40 }
 0x360   : > { %v913_v42 = vpop.permute.xlu0 %912 }
 0x361   : > { %v917_v51 = vmul.f32 %v913_v42, %v901_v43  ;;  %v918_v53 = vmul.f32 %v913_v42, %v902_v44 }
 0x362   : > { %v908_v45 = vpop.permute.xlu1 %907 }
 0x363   : > { %v915_v55 = vmul.f32 %v908_v45, %v899_v48  ;;  %v916_v56 = vmul.f32 %v908_v45, %v900_v50 }
 0x364   : > { %v927_v54 = vpop.permute.xlu0 %926 }
 0x365   : > { %v931_v61 = vadd.f32 %v927_v54, %v917_v51  ;;  %v932_v62 = vadd.f32 %v927_v54, %v918_v53 }
 0x366   : > { %v922_v63 = vpop.permute.xlu1 %921 }
 0x367   : > { %v2120_v4 = vmax.f32 %v931_v61, 0.0  ;;  %v929_v5 = vadd.f32 %v922_v63, %v915_v55  ;;  %v930_v6 = vadd.f32 %v922_v63, %v916_v56  ;;  %v2122_v49 = vmax.f32 %v932_v62, 0.0 }
 0x369   : > { %v2124_v52 = vmax.f32 %v929_v5, 0.0  ;;  %v2126_v11 = vmax.f32 %v930_v6, 0.0  ;;  %1035 = vrot.lane.b32.xlu0 %v2120_v4, %s2463_s30 }
 0x36b   : > { %1033 = vrot.lane.b32.xlu1 %v2124_v52, %s2463_s30  ;;  %v1074_v46 = vpack.c.bf16 %v2122_v49, %v2126_v11  ;;  %v1073_v47 = vpack.c.bf16 %v2120_v4, %v2124_v52 }
 0x36d   : > { %1039 = vrot.lane.b32.xlu0 %v2122_v49, %s2463_s30 }
 0x36f   : > { %1037 = vrot.lane.b32.xlu1 %v2126_v11, %s2463_s30  ;;  %s431_s30 = sand.u32 1, %s1734_s26  }
 0x370   : > { %s1540_s0 = sshll.u32 %s431_s30, 5 }
 0x371   : > { %1019 = vrot.lane.b32.xlu0 %v2120_v4, %s2464_s16 }
 0x373   : > { %1017 = vrot.lane.b32.xlu1 %v2124_v52, %s2464_s16 }
 0x375   : > { %1023 = vrot.lane.b32.xlu0 %v2122_v49, %s2464_s16 }
 0x377   : > { %1021 = vrot.lane.b32.xlu1 %v2126_v11, %s2464_s16  ;;  %s2470_s16 = smov 111  }
 0x379   : > { %1003 = vrot.lane.b32.xlu0 %v2120_v4, %s2465_s20 }
 0x37b   : > { %1001 = vrot.lane.b32.xlu1 %v2124_v52, %s2465_s20 }
 0x37d   : > { %1007 = vrot.lane.b32.xlu0 %v2122_v49, %s2465_s20 }
 0x37f   : > { %1005 = vrot.lane.b32.xlu1 %v2126_v11, %s2465_s20 }
 0x381   : > { %987 = vrot.lane.b32.xlu0 %v2120_v4, %s2466_s22 }
 0x383   : > { %985 = vrot.lane.b32.xlu1 %v2124_v52, %s2466_s22 }
 0x385   : > { %991 = vrot.lane.b32.xlu0 %v2122_v49, %s2466_s22 }
 0x387   : > { %989 = vrot.lane.b32.xlu1 %v2126_v11, %s2466_s22  ;;  %s1573_s22 = sshll.u32 %s1846_s29, 9  ;;  %s2382_s29 = scalar_lea.sflag [#allocation3], %s431_s30 }
 0x388   : > { %s2378_s21 = scalar_lea.hbm %s2436_s13, %s1573_s22 }
 0x389   : > { %971 = vrot.lane.b32.xlu0 %v2120_v4, %s2467_s23 }
 0x38b   : > { %969 = vrot.lane.b32.xlu1 %v2124_v52, %s2467_s23 }
 0x38d   : > { %975 = vrot.lane.b32.xlu0 %v2122_v49, %s2467_s23 }
 0x38f   : > { %973 = vrot.lane.b32.xlu1 %v2126_v11, %s2467_s23 }
 0x391   : > { %955 = vrot.lane.b32.xlu0 %v2120_v4, %s2468_s24 }
 0x393   : > { %953 = vrot.lane.b32.xlu1 %v2124_v52, %s2468_s24 }
 0x395   : > { %959 = vrot.lane.b32.xlu0 %v2122_v49, %s2468_s24 }
 0x397   : > { %957 = vrot.lane.b32.xlu1 %v2126_v11, %s2468_s24 }
 0x399   : > { %939 = vrot.lane.b32.xlu0 %v2120_v4, %s2469_s15 }
 0x39b   : > { %937 = vrot.lane.b32.xlu1 %v2124_v52, %s2469_s15 }
 0x39d   : > { %943 = vrot.lane.b32.xlu0 %v2122_v49, %s2469_s15 }
 0x39f   : > { %941 = vrot.lane.b32.xlu1 %v2126_v11, %s2469_s15 }
 0x3a1   : > { %1051 = vrot.lane.b32.xlu0 %v2120_v4, %s2470_s16 }
 0x3a3   : > { %1049 = vrot.lane.b32.xlu1 %v2124_v52, %s2470_s16 }
 0x3a5   : > { %1055 = vrot.lane.b32.xlu0 %v2122_v49, %s2470_s16 }
 0x3a7   : > { %1053 = vrot.lane.b32.xlu1 %v2126_v11, %s2470_s16  ;;  %s433_s16 = scalar_lea.vmem [#allocation2], %s1540_s0 }
 0x3a8   : > { %s1474_s20 = sshll.u32 %s433_s16, 4  ;;  %s2373_s20 = int_to_ptr.vmem [resolvable:$true] %s1474_s20 }
 0x3a9   : > { %1089 = vperm.xlu0 %1667, %v1085_v13   ;;  %s1682_s0 = scalar_lea.vmem %s2373_s20, 512  ;;  %p1689_p0 = scmp.lt.s32.totalorder %s2373_s20, %s1687_s2 }
 0x3aa   : > { %p1683_p11 = scmp.ne.s32.totalorder %s2373_s20, %s1682_s0  ;;  %p1690_p1 = scmp.lt.s32.totalorder %s1688_s3, %s1682_s0 }
 0x3ab   : > { %1094 = vperm.xlu1 %1668, %v1086_v15  }
 0x3ac   : > { %p1684_p12 = pnand %p1683_p11, %p1863_p5  ;;  %p1691_p2 = por %p1690_p1, %p1689_p0 }
 0x3ae   : > { %p1685_p13 = pneg %p1684_p12 }
 0x3b0   : > { %p1692_p3 = pnand %p1691_p2, %p1685_p13 }
 0x3db   : > { %v1036_v18 = vpop.permute.xlu0 %1035 }
 0x3dd   : > { %v1034_v19 = vpop.permute.xlu1 %1033 }
 0x3df   : > { %v1040_v21 = vpop.permute.xlu0 %1039 }
 0x3e0   : > { %v1042_v22 = vsel %vm583_vm2, %v1036_v18, %v1040_v21  ;;  %v1044_v29 = vsel %vm583_vm2, %v1040_v21, %v1036_v18 }
 0x3e1   : > { %v1038_v30 = vpop.permute.xlu1 %1037  ;;  %v1047_v33 = vmul.f32 %v1042_v22, %v1958_v23  ;;  %v1048_v35 = vmul.f32 %v1044_v29, %v1967_v27 }
 0x3e2   : > { %v1041_v31 = vsel %vm583_vm2, %v1034_v19, %v1038_v30  ;;  %v1043_v32 = vsel %vm583_vm2, %v1038_v30, %v1034_v19 }
 0x3e3   : > { %v1045_v8 = vmul.f32 %v1041_v31, %v1958_v23  ;;  %v1046_v9 = vmul.f32 %v1043_v32, %v1967_v27  ;;  %v1020_v36 = vpop.permute.xlu0 %1019 }
 0x3e5   : > { %v1079_v37 = vpack.c.bf16 %v1047_v33, %v1045_v8  ;;  %v1018_v39 = vpop.permute.xlu1 %1017  ;;  %v1080_v40 = vpack.c.bf16 %v1048_v35, %v1046_v9 }
 0x3e7   : > { %1109 = vmatprep.subr.bf16.mxu1 %v1080_v40  ;;  %v1024_v41 = vpop.permute.xlu0 %1023 }
 0x3e8   : > { %v1026_v42 = vsel %vm561_vm1, %v1020_v36, %v1024_v41  ;;  %v1028_v43 = vsel %vm561_vm1, %v1024_v41, %v1020_v36  ;;  %1110 = vmatpush1.bf16.msra.mxu1 %v1079_v37 }
 0x3e9   : > { %v1022_v44 = vpop.permute.xlu1 %1021  ;;  %v1031_v27 = vmul.f32 %v1026_v42, %v1947_v17  ;;  %v1032_v48 = vmul.f32 %v1028_v43, %v1951_v20 }
 0x3ea   : > { %v1025_v45 = vsel %vm561_vm1, %v1018_v39, %v1022_v44  ;;  %v1027_v23 = vsel %vm561_vm1, %v1022_v44, %v1018_v39 }
 0x3eb   : > { %v1029_v50 = vmul.f32 %v1025_v45, %v1947_v17  ;;  %v1030_v51 = vmul.f32 %v1027_v23, %v1951_v20  ;;  %v1004_v53 = vpop.permute.xlu0 %1003 }
 0x3ed   : > { %v1077_v54 = vpack.c.bf16 %v1031_v27, %v1029_v50  ;;  %v1002_v55 = vpop.permute.xlu1 %1001  ;;  %v1078_v56 = vpack.c.bf16 %v1032_v48, %v1030_v51 }
 0x3ef   : > { %1111 = vmatprep.subr.bf16.mxu1 %v1078_v56  ;;  %v1008_v61 = vpop.permute.xlu0 %1007 }
 0x3f0   : > { %v1010_v62 = vsel %vm539_vm4, %v1004_v53, %v1008_v61  ;;  %v1012_v63 = vsel %vm539_vm4, %v1008_v61, %v1004_v53  ;;  %1112 = vmatpush1.bf16.msra.mxu1 %v1077_v54 }
 0x3f1   : > { %v1006_v5 = vpop.permute.xlu1 %1005  ;;  %v1015_v20 = vmul.f32 %v1010_v62, %v1974_v34  ;;  %v1016_v12 = vmul.f32 %v1012_v63, %v1982_v38 }
 0x3f2   : > { %v1009_v6 = vsel %vm539_vm4, %v1002_v55, %v1006_v5  ;;  %v1011_v17 = vsel %vm539_vm4, %v1006_v5, %v1002_v55 }
 0x3f3   : > { %v1013_v13 = vmul.f32 %v1009_v6, %v1974_v34  ;;  %v1014_v15 = vmul.f32 %v1011_v17, %v1982_v38  ;;  %v988_v18 = vpop.permute.xlu0 %987 }
 0x3f5   : > { %v1075_v19 = vpack.c.bf16 %v1015_v20, %v1013_v13  ;;  %v986_v21 = vpop.permute.xlu1 %985  ;;  %v1076_v22 = vpack.c.bf16 %v1016_v12, %v1014_v15 }
 0x3f7   : > { %1113 = vmatprep.subr.bf16.mxu1 %v1076_v22  ;;  %v992_v29 = vpop.permute.xlu0 %991 }
 0x3f8   : > { %v994_v30 = vsel %vm517_vm6, %v988_v18, %v992_v29  ;;  %v996_v31 = vsel %vm517_vm6, %v992_v29, %v988_v18  ;;  %1114 = vmatpush1.bf16.msra.mxu1 %v1075_v19 }
 0x3f9   : > { %v990_v32 = vpop.permute.xlu1 %989  ;;  %1115 = vmatprep.subr.bf16.mxu1 %v1074_v46  ;;  %v999_v33 = vmul.f32 %v996_v31, %v2012_v59  ;;  %v1000_v35 = vmul.f32 %v994_v30, %v2015_v60 }
 0x3fa   : > { %v993_v34 = vsel %vm517_vm6, %v986_v21, %v990_v32  ;;  %v995_v38 = vsel %vm517_vm6, %v990_v32, %v986_v21 }
 0x3fb   : > { %v997_v8 = vmul.f32 %v995_v38, %v2012_v59  ;;  %v998_v9 = vmul.f32 %v993_v34, %v2015_v60  ;;  %v972_v36 = vpop.permute.xlu0 %971 }
 0x3fc   : > { %1116 = vmatpush1.bf16.msra.mxu1 %v1073_v47 }
 0x3fd   : > { %v1071_v49 = vpack.c.bf16 %v999_v33, %v997_v8  ;;  %v970_v11 = vpop.permute.xlu1 %969  ;;  %v1072_v46 = vpack.c.bf16 %v1000_v35, %v998_v9 }
 0x3ff   : > { %v976_v37 = vpop.permute.xlu0 %975  ;;  %1117 = vmatprep.subr.bf16.mxu1 %v1072_v46 }
 0x400   : > { %v978_v39 = vsel %vm495_vm5, %v972_v36, %v976_v37  ;;  %v980_v40 = vsel %vm495_vm5, %v976_v37, %v972_v36  ;;  %1118 = vmatpush1.bf16.msra.mxu1 %v1071_v49 }
 0x401   : > { %v974_v59 = vpop.permute.xlu1 %973  ;;  %v983_v52 = vmul.f32 %v980_v40, %v2005_v57  ;;  %v984_v47 = vmul.f32 %v978_v39, %v2008_v58 }
 0x402   : > { %v977_v60 = vsel %vm495_vm5, %v970_v11, %v974_v59  ;;  %v979_v4 = vsel %vm495_vm5, %v974_v59, %v970_v11  ;;  %v1672_v11 = vld [vmem:[%s2430_s7] ss:$8 sps:$4 sm:$0xff]  }
 0x403   : > { %v981_v41 = vmul.f32 %v979_v4, %v2005_v57  ;;  %v982_v42 = vmul.f32 %v977_v60, %v2008_v58  ;;  %v956_v43 = vpop.permute.xlu0 %955 }
 0x405   : > { %v1069_v44 = vpack.c.bf16 %v983_v52, %v981_v41  ;;  %v954_v45 = vpop.permute.xlu1 %953  ;;  %v1070_v23 = vpack.c.bf16 %v984_v47, %v982_v42 }
 0x407   : > { %v960_v27 = vpop.permute.xlu0 %959  ;;  %1119 = vmatprep.subr.bf16.mxu1 %v1070_v23 }
 0x408   : > { %v962_v48 = vsel %vm473_vm8, %v956_v43, %v960_v27  ;;  %v964_v50 = vsel %vm473_vm8, %v960_v27, %v956_v43  ;;  %1120 = vmatpush1.bf16.msra.mxu1 %v1069_v44  ;;  %v1154_v27 = vld [vmem:[%s2433_s10] sm:$0xff] }
 0x409   : > { %v958_v51 = vpop.permute.xlu1 %957  ;;  %v967_v58 = vmul.f32 %v964_v50, %v2044_v26  ;;  %v968_v54 = vmul.f32 %v962_v48, %v2047_v28  ;;  %v1155_v48 = vld [vmem:[%s2433_s10 + $0x8] sm:$0xff] }
 0x40a   : > { %v961_v53 = vsel %vm473_vm8, %v954_v45, %v958_v51  ;;  %v963_v57 = vsel %vm473_vm8, %v958_v51, %v954_v45 }
 0x40b   : > { %v965_v55 = vmul.f32 %v963_v57, %v2044_v26  ;;  %v966_v56 = vmul.f32 %v961_v53, %v2047_v28  ;;  %v940_v61 = vpop.permute.xlu0 %939  ;;  %v1376_v53 = vpack.c.bf16 %v1878_v0, %v1878_v0  ;;  %v1673_v0 = vld [vmem:[%s2434_s11] sm:$0xff]  }
 0x40d   : > { %v1067_v62 = vpack.c.bf16 %v967_v58, %v965_v55  ;;  %v938_v63 = vpop.permute.xlu1 %937  ;;  %v1068_v5 = vpack.c.bf16 %v968_v54, %v966_v56  ;;  %v1377_v58 = vpack.c.bf16 %v1884_v1, %v1884_v1  ;;  %v1400_v55 = vsel %vm654_vm3, %v1376_v53, 0 }
 0x40f   : > { %v944_v6 = vpop.permute.xlu0 %943  ;;  %1121 = vmatprep.subr.bf16.mxu1 %v1068_v5 }
 0x410   : > { %v946_v17 = vsel %vm451_vm7, %v940_v61, %v944_v6  ;;  %v948_v20 = vsel %vm451_vm7, %v944_v6, %v940_v61  ;;  %1122 = vmatpush1.bf16.msra.mxu1 %v1067_v62 }
 0x411   : > { %v942_v12 = vpop.permute.xlu1 %941  ;;  %v951_v28 = vmul.f32 %v948_v20, %v2037_v24  ;;  %v952_v15 = vmul.f32 %v946_v17, %v2040_v25 }
 0x412   : > { %v945_v13 = vsel %vm451_vm7, %v938_v63, %v942_v12  ;;  %v947_v26 = vsel %vm451_vm7, %v942_v12, %v938_v63  ;;  %v1152_v12 = vld [vmem:[%s2432_s9] sm:$0xff] }
 0x413   : > { %v949_v18 = vmul.f32 %v947_v26, %v2037_v24  ;;  %v950_v19 = vmul.f32 %v945_v13, %v2040_v25  ;;  %v1052_v21 = vpop.permute.xlu0 %1051 }
 0x415   : > { %v1065_v22 = vpack.c.bf16 %v951_v28, %v949_v18  ;;  %v1050_v29 = vpop.permute.xlu1 %1049  ;;  %v1066_v30 = vpack.c.bf16 %v952_v15, %v950_v19  ;;  %v1379_v15 = vld [vmem:[%s2435_s12 + $0x8] sm:$0xff]  ;;  %v1378_v18 = vld [vmem:[%s2435_s12] sm:$0xff] }
 0x417   : > { %v1056_v31 = vpop.permute.xlu0 %1055  ;;  %1123 = vmatprep.subr.bf16.mxu1 %v1066_v30 }
 0x418   : > { %v1058_v32 = vsel %vm605_vm0, %v1052_v21, %v1056_v31  ;;  %v1060_v34 = vsel %vm605_vm0, %v1056_v31, %v1052_v21  ;;  %1124 = vmatpush1.bf16.msra.mxu1 %v1065_v22 }
 0x419   : > { %v1054_v38 = vpop.permute.xlu1 %1053  ;;  %v1063_v25 = vmul.f32 %v1058_v32, %v1937_v14  ;;  %v1064_v35 = vmul.f32 %v1060_v34, %v1943_v16 }
 0x41a   : > { %v1057_v33 = vsel %vm605_vm0, %v1050_v29, %v1054_v38  ;;  %v1059_v24 = vsel %vm605_vm0, %v1054_v38, %v1050_v29 }
 0x41b   : > { %v1061_v8 = vmul.f32 %v1057_v33, %v1937_v14  ;;  %v1062_v9 = vmul.f32 %v1059_v24, %v1943_v16 }
 0x41d   : > { %v1081_v36 = vpack.c.bf16 %v1063_v25, %v1061_v8  ;;  %v1082_v49 = vpack.c.bf16 %v1064_v35, %v1062_v9 }
 0x41f   : > { %1139 = vmatprep.subr.bf16.mxu1 %v1082_v49 }
 0x420   : > { %1140 = vmatpush2.bf16.msra.mxu1 %v1081_v36 }
 0x423   : > { %1142 = vmatmul.mubr.bf16.vlgmr.msra.gmra.mxu1 %v1672_v11 }
 0x424   : > { %v1090_v7 = vpop.permute.xlu0 %1089 }
 0x426   : > { %v1095_v59 = vpop.permute.xlu1 %1094 }
 0x4e3   : > { %v1143_v46 = vpop.f32.mrf.mxu1 }
 0x4e4   : > { %v2311_v39 = vadd.f32 %v1143_v46, %v1090_v7 }
 0x4e5   : > { %v1145_v37 = vpop.f32.mrf.mxu1 }
 0x4e6   : > { %v2313_v40 = vadd.f32 %v1145_v37, %v1090_v7  ;;  %v1162_v45 = vmul.f32 %v2311_v39, %v2311_v39 }
 0x4e7   : > { %v1147_v14 = vpop.f32.mrf.mxu1 }
 0x4e8   : > { %v2315_v60 = vadd.f32 %v1147_v14, %v1095_v59  ;;  %v1156_v16 = vadd.f32 %v2313_v40, %v2311_v39  ;;  %v1163_v43 = vmul.f32 %v2313_v40, %v2313_v40 }
 0x4e9   : > { %v1149_v4 = vpop.f32.mrf.mxu1 }
 0x4ea   : > { %v2319_v52 = vadd.f32 %v1149_v4, %v1095_v59  ;;  %1157 = vadd.xlane.f32.xlu0 %v1156_v16  ;;  %v1164_v41 = vmul.f32 %v2315_v60, %v2315_v60  ;;  %v1166_v23 = vadd.f32 %v1163_v43, %v1162_v45 }
 0x4ec   : > { %v1159_v47 = vadd.f32 %v2319_v52, %v2315_v60  ;;  %v1165_v42 = vmul.f32 %v2319_v52, %v2319_v52 }
 0x4ee   : > { %1160 = vadd.xlane.f32.xlu1 %v1159_v47  ;;  %v1169_v44 = vadd.f32 %v1165_v42, %v1164_v41 }
 0x4f0   : > { %1170 = vadd.xlane.f32.xlu0 %v1169_v44 }
 0x4f2   : > { %1167 = vadd.xlane.f32.xlu1 %v1166_v23 }
 0x503   : > { %1362 = vperm.xlu1 %1668, %v1154_v27  }
 0x506   : > { %1367 = vperm.xlu0 %1667, %v1155_v48  }
 0x573   : > { %v1158_v50 = vpop.xlane.xlu0 %1157 }
 0x577   : > { %v1161_v51 = vpop.xlane.xlu1 %1160 }
 0x578   : > { %1604 = vmatprep.subr.mxu0 %v1161_v51 }
 0x579   : > { %1605 = vmatpush3.msra.mxu0 %v1161_v51  ;;  %v1171_v57 = vpop.xlane.xlu0 %1170 }
 0x57a   : > { %1606 = vmatprep.subr.mxu0 %v1158_v50 }
 0x57b   : > { %1607 = vmatpush3.msra.mxu0 %v1158_v50  ;;  %v1168_v54 = vpop.xlane.xlu1 %1167 }
 0x57c   : > { %1609 = vmatmul.mubr.msk.f32.vlgmr.msra.gmra.mxu0 %vm724_vm10, %v2096_v10  ;;  %1611 = vmatprep.subr.mxu0 %v1171_v57 }
 0x57d   : > { %1612 = vmatpush3.msra.mxu0 %v1171_v57  ;;  %1615 = vmatprep.mubr.msk.f32.mxu0 %vm724_vm10, %v2087_v3 }
 0x57e   : > { %1613 = vmatprep.subr.mxu0 %v1168_v54 }
 0x57f   : > { %1614 = vmatpush3.msra.mxu0 %v1168_v54  ;;  %v1363_v21 = vpop.permute.xlu1 %1362 }
 0x580   : > { %1616 = vmatmul.mubr.msk.f32.vlgmr.msra.gmra.mxu0 %vm724_vm10, %v2096_v10  ;;  %1565 = vmatprep.subr.msk.bf16.mxu0 %vm654_vm3, %v1377_v58 }
 0x581   : > { %1420 = vmatpush1.bf16.msra.mxu0 %v1400_v55  ;;  %1437 = vmatprep.mubr.bf16.mxu0 %v1750_v2  ;;  %v1153_v2 = vld [vmem:[%s2432_s9 + $0x8] sm:$0xff]  ;;  %v1368_v22 = vpop.permute.xlu0 %1367 }
 0x584   : > { %1566 = vmatmul.mubr.msk.bf16.vlgmr.msra.gmra.mxu0 %vm1395_vm11, %v1673_v0 }
 0x63c   : > { %v1610_v1 = vpop.f32.mrf.mxu0 }
 0x63d   : > { %1337 = vperm.xlu1 %1668, %v1610_v1   ;;  %v1323_v56 = vmul.f32 %v1610_v1, %v1610_v1 }
 0x63e   : > { %v1238_v3 = vpop.f32.mrf.mxu0 }
 0x63f   : > { %1332 = vperm.xlu0 %1667, %v1238_v3   ;;  %v1322_v62 = vmul.f32 %v1238_v3, %v1238_v3 }
 0x640   : > { %v1617_v61 = vpop.f32.mrf.mxu0 }
 0x641   : > { %v1325_v63 = vsub.f32 %v1617_v61, %v1323_v56 }
 0x642   : > { %v1313_v10 = vpop.f32.mrf.mxu0 }
 0x643   : > { %v1327_v5 = vadd.f32 1e-05, %v1325_v63  ;;  %v1324_v6 = vsub.f32 %v1313_v10, %v1322_v62 }
 0x644   : > { %v1439_v19 = vpop.f32.mrf.mxu0 }
 0x645   : > { %1678 = vrsqrt.f32 %v1327_v5  ;;  %v1326_v17 = vadd.f32 1e-05, %v1324_v6 }
 0x646   : > { %v1441_v29 = vpop.f32.mrf.mxu0 }
 0x647   : > { %1680 = vrsqrt.f32 %v1326_v17 }
 0x648   : > { %v1443_v33 = vpop.f32.mrf.mxu0 }
 0x64a   : > { %v1445_v46 = vpop.f32.mrf.mxu0 }
 0x652   : > { %v1679_v20 = vpop.eup %1678 }
 0x653   : > { %v1345_v13 = vmul.f32 %v1679_v20, %v1153_v2 }
 0x654   : > { %v1681_v26 = vpop.eup %1680 }
 0x655   : > { %1353 = vperm.xlu0 %1667, %v1345_v13   ;;  %v1344_v28 = vmul.f32 %v1681_v26, %v1152_v12 }
 0x657   : > { %1348 = vperm.xlu1 %1668, %v1344_v28  }
 0x659   : > { %1387 = vperm.xlu0 %1667, %v1379_v15  }
 0x65b   : > { %1382 = vperm.xlu1 %1668, %v1378_v18  }
 0x6b8   : > { %v1338_v30 = vpop.permute.xlu1 %1337 }
 0x6b9   : > { %v1342_v32 = vsub.f32 %v2315_v60, %v1338_v30  ;;  %v1343_v34 = vsub.f32 %v2319_v52, %v1338_v30 }
 0x6ba   : > { %v1333_v31 = vpop.permute.xlu0 %1332 }
 0x6bb   : > { %v1340_v24 = vsub.f32 %v2311_v39, %v1333_v31  ;;  %v1341_v25 = vsub.f32 %v2313_v40, %v1333_v31 }
 0x6d0   : > { %v1354_v38 = vpop.permute.xlu0 %1353 }
 0x6d1   : > { %v1358_v35 = vmul.f32 %v1354_v38, %v1342_v32  ;;  %v1359_v8 = vmul.f32 %v1354_v38, %v1343_v34 }
 0x6d2   : > { %v1349_v9 = vpop.permute.xlu1 %1348 }
 0x6d3   : > { %v1356_v36 = vmul.f32 %v1349_v9, %v1340_v24  ;;  %v1357_v49 = vmul.f32 %v1349_v9, %v1341_v25  ;;  %v1372_v7 = vadd.f32 %v1368_v22, %v1358_v35  ;;  %v1373_v37 = vadd.f32 %v1368_v22, %v1359_v8 }
 0x6d4   : > { %v1388_v11 = vpop.permute.xlu0 %1387 }
 0x6d5   : > { %v1444_v59 = vadd.f32 %v1443_v33, %v1388_v11  ;;  %v1446_v14 = vadd.f32 %v1445_v46, %v1388_v11  ;;  %v1370_v60 = vadd.f32 %v1363_v21, %v1356_v36  ;;  %v1371_v16 = vadd.f32 %v1363_v21, %v1357_v49 }
 0x6d6   : > { %v1383_v4 = vpop.permute.xlu1 %1382 }
 0x6d7   : > { %v1450_v39 = vadd.f32 %v1444_v59, %v1372_v7  ;;  %v1451_v40 = vadd.f32 %v1446_v14, %v1373_v37  ;;  %v1440_v52 = vadd.f32 %v1439_v19, %v1383_v4  ;;  %v1442_v47 = vadd.f32 %v1441_v29, %v1383_v4 }
 0x6d9   : > { %v1454_v41 = vmax.f32 %v1450_v39, 0.0  ;;  %v1455_v42 = vmax.f32 %v1451_v40, 0.0  ;;  %v1448_v43 = vadd.f32 %v1440_v52, %v1370_v60  ;;  %v1449_v44 = vadd.f32 %v1442_v47, %v1371_v16 }
 0x6db   : > { %1458 = vst [vmem:[%s433_s16 + $0x10] sm:$0xff] %v1454_v41  ;;  %1459 = vst [vmem:[%s433_s16 + $0x18] sm:$0xff] %v1455_v42  ;;  %v1452_v45 = vmax.f32 %v1448_v43, 0.0  ;;  %v1453_v23 = vmax.f32 %v1449_v44, 0.0 }
 0x6dd   : > { %1456 = vst [vmem:[%s433_s16] sm:$0xff] %v1452_v45  ;;  %1457 = vst [vmem:[%s433_s16 + $0x8] sm:$0xff] %v1453_v23 }
 0x6de   : > { %1695 = shalt.err (!%p1692_p3)
}
 0x6df   : > { %s1696_s30 = scalar_lea.hbm %s2378_s21, 512  ;;  %s1700_s1 = scalar_lea.hbm %s2436_s13, 1024 }
 0x6e0   : > { %p1697_p4 = scmp.ne.s32.totalorder %s2378_s21, %s1696_s30  ;;  %p1701_p9 = scmp.lt.s32.totalorder %s2378_s21, %s2436_s13 }
 0x6e1   : > { %p1702_p10 = scmp.lt.s32.totalorder %s1700_s1, %s1696_s30 }
 0x6e2   : > { %p1698_p7 = pnand %p1697_p4, %p1863_p5 }
 0x6e3   : > { %p1703_p11 = por %p1702_p10, %p1701_p9 }
 0x6e4   : > { %p1699_p8 = pneg %p1698_p7 }
 0x6e6   : > { %p1704_p12 = pnand %p1703_p11, %p1699_p8 }
 0x6e8   : > { %1707 = shalt.err (!%p1704_p12)
}
 0x6e9   : > { %s1754_s2 = smov 256  }
 0x6ea   : > { %1618 = dma.vmem_to_hbm [thread:$0]  (%p1863_p5), %s2373_s20, 512, %s2378_s21, %s2382_s29, %s1754_s2, %s1754_s2, %s2468_s24  }
 0x6eb PF: > { %p1624_p13 = scmp.ge.s32.totalorder %s1742_s28, 2  ;;  %s1489_s3 = sand.u32 1, %s1730_s25  }
 0x6ec   : > { %s1490_s0 = scalar_lea.sflag [#allocation3], %s1489_s3 }
 0x6ed   : > { %p1621_p0 = pnand %p1624_p13, %p1867_p6 }
 0x6ef   : > { %p1622_p1 = pneg %p1621_p0 }
 0x6f1   : > { %1725 = dma.done.wait (%p1622_p1), %s1490_s0, 512  }
 0x6f2   : > { %1727 = vsyncadd (%p1622_p1), %s1490_s0, 4294966784  ;;  %p23_p2 = scmp.ge.s32.totalorder %s1850_s14, 4   ;;  %s2471_s25 = smov %s1734_s26 }
 0x6f3   : > { %s2472_s26 = smov %s1738_s27  ;;  %s2473_s27 = smov %s1861_s17 }
 0x6f4   : > { %s2474_s28 = smov %s1850_s14  ;;  %25 = sbr.rel (!%p23_p2) target bundleno = 8 (0x8), region = 114 }
 0x6f9   :  { %1495 = vsyncpa [#allocation3], 1 }
 0x6fa   :  { %1497 = vsyncpa [#allocation3 + $0x1], 1 }

</bundles_post_ra>
